<compile_context>
chip_gen: v7x
topology: tpu7x:2x2x1
jax: 0.10.0
libtpu: 0.0.40
codegen_flags: <defaults>
</compile_context>

<pallas_src>
import numpy as np
import jax
import jax.numpy as jnp
from jax.experimental import pallas as pl
from jax.experimental.pallas import tpu as pltpu

BITS = 4
PACK = 32 // BITS          # 8 values per int32
MASK = (1 << BITS) - 1     # 0xF


def _quantlinear_kernel(x_ref, qw_ref, scale_ref, zero_ref, bias_ref, o_ref, w_ref):
    """grid = (N_tiles, M_tiles); N outer ("parallel"), M inner ("arbitrary").

    x_ref    : (TM, K)  bf16   activations (natural column order)
    qw_ref   : (Kp, TN) int32  nibble-major packed 4-bit weights
    scale_ref: (G,  TN) bf16*  per-group scales          (*dequant_dtype)
    zero_ref : (G,  TN) bf16*  per-group zero points (+1 already applied)
    bias_ref : (1,  TN) f32
    o_ref    : (TM, TN) bf16   (out_dtype)
    w_ref    : (K,  TN) bf16   persistent VMEM scratch: dequantized weight tile
    """
    Kp, TN = qw_ref.shape
    K = Kp * PACK
    G = scale_ref.shape[0]
    groupsize = K // G
    math_dtype = scale_ref.dtype

    # Dequantize the (K, TN) weight tile ONCE per N tile (first M step). The
    # scratch persists across the inner ("arbitrary") M axis, so every other M
    # step reuses it: dequant VPU cost is amortized over the whole M range.
    @pl.when(pl.program_id(1) == 0)
    def _dequant():
        qw = pltpu.bitcast(qw_ref[...], jnp.uint32)     # logical shifts
        scale = scale_ref[...]                          # (G, TN)
        zero = zero_ref[...]                            # (G, TN)
        for j in range(PACK):                           # static unroll (8 nibbles)
            if j == 0:
                nib = jnp.bitwise_and(qw, jnp.uint32(MASK))
            elif j == PACK - 1:
                nib = jnp.right_shift(qw, jnp.uint32(BITS * j))   # top nibble: no mask
            else:
                nib = jnp.bitwise_and(
                    jnp.right_shift(qw, jnp.uint32(BITS * j)), jnp.uint32(MASK))
            # (w - zero) is exact in low precision (small ints); only the scale
            # multiply rounds -> cheaper than f32 on v6e/v7x and at least as
            # accurate as the (w*scale - scale*zero) form.
            w_q = pltpu.bitcast(nib, jnp.int32).astype(math_dtype)
            row0 = j * Kp
            if Kp % groupsize == 0:
                # Nibble slab spans Kp//groupsize complete groups -> one
                # broadcasted op + one contiguous store per nibble.
                gs = Kp // groupsize
                g0 = row0 // groupsize
                w3 = w_q.reshape(gs, groupsize, TN)
                z3 = zero[g0:g0 + gs, :].reshape(gs, 1, TN)
                s3 = scale[g0:g0 + gs, :].reshape(gs, 1, TN)
                w_ref[row0:row0 + Kp, :] = (
                    ((w3 - z3) * s3).reshape(Kp, TN).astype(w_ref.dtype))
            elif groupsize % Kp == 0:
                # Whole nibble slab lies inside a single group.
                g = row0 // groupsize
                w_ref[row0:row0 + Kp, :] = (
                    ((w_q - zero[g:g + 1, :]) * scale[g:g + 1, :]).astype(w_ref.dtype))
            else:
                # Fallback: static per-group chunks inside the slab.
                g_first = row0 // groupsize
                g_last = (row0 + Kp - 1) // groupsize
                for g in range(g_first, g_last + 1):
                    lo = max(row0, g * groupsize) - row0
                    hi = min(row0 + Kp, (g + 1) * groupsize) - row0
                    w_ref[row0 + lo:row0 + hi, :] = (
                        ((w_q[lo:hi, :] - zero[g:g + 1, :])
                         * scale[g:g + 1, :]).astype(w_ref.dtype))

    # Single full-K matmul per (M, N) tile (bf16 MXU, f32 accumulation).
    acc = jnp.dot(x_ref[...], w_ref[...], preferred_element_type=jnp.float32)
    o_ref[...] = (acc + bias_ref[...]).astype(o_ref.dtype)


def _round_up(a, b):
    return (a + b - 1) // b * b


def _vmem_estimate(TM, K, TN, G, out_bytes):
    Kp = K // PACK
    return (K * TN * 2            # dequant scratch (single buffer)
            + 2 * TM * K * 2      # x, double-buffered
            + 2 * Kp * TN * 4     # packed weights
            + 2 * 2 * G * TN * 4  # scales + zeros (conservative: f32)
            + 2 * TN * 4          # bias
            + 2 * TM * TN * out_bytes)


def _vmem_capacity_bytes():
    try:
        return int(getattr(pltpu.get_tpu_info(), "vmem_capacity_bytes", 64 << 20))
    except Exception:
        return 64 << 20


def quant_linear_forward(x, qweight_tpu, qzeros, scales, bias, groupsize,
                         tile_m=256, tile_n=512,
                         out_dtype=jnp.bfloat16, dequant_dtype=jnp.bfloat16):
    """QuantLinear.forward (bits=4).  `qweight_tpu` must be in the nibble-major
    layout produced by `repack_qweight_nibble_major` (one-time, at load)."""
    orig_shape = x.shape
    K = orig_shape[-1]
    x2d = x.reshape(-1, K)
    M = x2d.shape[0]
    Kp, N = qweight_tpu.shape
    G = scales.shape[0]

    assert K == Kp * PACK, "infeatures mismatch with packed qweight"
    assert K == G * groupsize, "groupsize must divide infeatures"
    assert groupsize % PACK == 0, "groupsize must be a multiple of 32//bits"
    assert Kp % 8 == 0, "infeatures must be a multiple of 64"
    assert N % 128 == 0, "outfeatures must be a multiple of 128"
    # TODO(synk): act-order checkpoints (permuted g_idx) are not supported;
    # this kernel assumes the canonical g_idx = arange(infeatures)//groupsize.

    # --- tiny wrapper-side glue: (G, N//8) qzeros -> (G, N) zero points (+1) --
    shifts = jnp.arange(PACK, dtype=jnp.int32) * BITS
    z = jnp.bitwise_and(
        jnp.right_shift(qzeros[:, :, None], shifts[None, None, :]), MASK) + 1
    zeros_q = z.reshape(G, N).astype(dequant_dtype)     # values 1..16: exact
    scales_q = scales.astype(dequant_dtype)

    if bias is None:
        bias = jnp.zeros((N,), jnp.float32)
    bias2d = bias.astype(jnp.float32).reshape(1, N)

    # bf16 activations (matches torch x.half() matmul). No extra pass if the
    # caller already supplies bf16.
    if x2d.dtype != jnp.bfloat16:
        x2d = x2d.astype(jnp.bfloat16)

    # --- tile selection (VMEM-aware) ------------------------------------------
    out_bytes = jnp.dtype(out_dtype).itemsize
    vmem_cap = _vmem_capacity_bytes()
    budget = int(vmem_cap * 0.6)

    TM = min(tile_m, _round_up(M, 16))      # bf16 sublane packing: multiple of 16
    tn_candidates = []
    for c in (tile_n, 512, 384, 256, 128):
        if c % 128 == 0 and N % c == 0 and c not in tn_candidates:
            tn_candidates.append(c)
    TN = tn_candidates[-1]
    for c in tn_candidates:
        if _vmem_estimate(TM, K, c, G, out_bytes) <= budget:
            TN = c
            break
    while TM > 16 and _vmem_estimate(TM, K, TN, G, out_bytes) > budget:
        TM = max(16, _round_up(TM // 2, 16))
    # TODO(synk): for K >= ~16k on v7x (64 MiB VMEM) add a K grid axis with an
    # f32 accumulator and a (TK, TN) dequant slab instead of full-(K, TN).

    M_pad = _round_up(M, TM)
    if M_pad != M:
        x2d = jnp.pad(x2d, ((0, M_pad - M), (0, 0)))

    grid = (N // TN, M_pad // TM)           # N outer (parallel), M inner (arbitrary)

    est = _vmem_estimate(TM, K, TN, G, out_bytes)
    vmem_limit = int(min(max(int(est * 1.5) + (4 << 20), 32 << 20), vmem_cap))

    out = pl.pallas_call(
        _quantlinear_kernel,
        out_shape=jax.ShapeDtypeStruct((M_pad, N), out_dtype),
        grid_spec=pltpu.PrefetchScalarGridSpec(
            num_scalar_prefetch=0,
            grid=grid,
            in_specs=[
                pl.BlockSpec((TM, K), lambda n, m: (m, 0)),     # x (full K)
                pl.BlockSpec((Kp, TN), lambda n, m: (0, n)),    # packed weights
                pl.BlockSpec((G, TN), lambda n, m: (0, n)),     # group scales
                pl.BlockSpec((G, TN), lambda n, m: (0, n)),     # group zeros (+1)
                pl.BlockSpec((1, TN), lambda n, m: (0, n)),     # bias
            ],
            out_specs=pl.BlockSpec((TM, TN), lambda n, m: (m, n)),
            scratch_shapes=[pltpu.VMEM((K, TN), jnp.bfloat16)],
        ),
        compiler_params=pltpu.CompilerParams(
            dimension_semantics=("parallel", "arbitrary"),
            vmem_limit_bytes=vmem_limit),
    )(x2d, qweight_tpu, scales_q, zeros_q, bias2d)

    if M_pad != M:
        out = out[:M]
    return out.reshape(orig_shape[:-1] + (N,))


# ---------------------------------------------------------------------------
# Offline (model-load-time) packing helpers.
# ---------------------------------------------------------------------------
def _pack_4bit_rows(int_vals_np):
    """Standard GPTQ packing: (K, N) 4-bit ints -> (K//8, N) int32, row p
    nibble j holds intweight row p*8 + j (matches QuantLinear.pack)."""
    K, N = int_vals_np.shape
    iw = int_vals_np.astype(np.uint32).reshape(K // PACK, PACK, N)
    packed = np.zeros((K // PACK, N), dtype=np.uint32)
    for j in range(PACK):
        packed |= iw[:, j, :] << (BITS * j)
    return packed.view(np.int32)


def _pack_4bit_cols(int_vals_np):
    """Pack (G, N) 4-bit ints along columns into (G, N//8) int32 (qzeros)."""
    G, N = int_vals_np.shape
    z = int_vals_np.astype(np.uint32).reshape(G, N // PACK, PACK)
    packed = np.zeros((G, N // PACK), dtype=np.uint32)
    for j in range(PACK):
        packed |= z[:, :, j] << (BITS * j)
    return packed.view(np.int32)


def repack_qweight_nibble_major(qweight_std_np):
    """One-time relayout of a standard GPTQ qweight into the TPU kernel layout.

    Standard GPTQ : packed row p, nibble j  <-  intweight row p*8 + j
    TPU layout    : packed row p, nibble j  <-  intweight row j*Kp + p
    so nibble j unpacks to the contiguous natural-K slab [j*Kp, (j+1)*Kp) and
    no per-call activation permutation is needed.
    """
    q = np.ascontiguousarray(qweight_std_np).view(np.uint32)
    Kp, N = q.shape
    shifts = (np.arange(PACK, dtype=np.uint32) * BITS)[None, :, None]
    iw = ((q[:, None, :] >> shifts) & MASK).reshape(Kp * PACK, N)   # natural K order
    out = np.zeros((Kp, N), dtype=np.uint32)
    for j in range(PACK):
        out |= iw[j * Kp:(j + 1) * Kp, :] << np.uint32(BITS * j)
    return out.view(np.int32)


if __name__ == "__main__":
    # Module config: bits=4, groupsize=32, infeatures=128, outfeatures=256, bias=True.
    # x has 2*40=80 flattened rows > kernel_switch_threshold=64 -> dequant path.
    infeatures, outfeatures, groupsize = 128, 256, 32
    G = infeatures // groupsize
    Kp = infeatures // PACK

    key = jax.random.PRNGKey(0)
    kx, kw, kz, ks, kb = jax.random.split(key, 5)

    x = jax.random.normal(kx, (2, 40, infeatures), dtype=jnp.float32)
    intweight = jax.random.randint(kw, (infeatures, outfeatures), 0, 16, dtype=jnp.int32)
    zeros_m1 = jax.random.randint(kz, (G, outfeatures), 0, 16, dtype=jnp.int32)  # stored zero-1
    scales = jax.random.uniform(ks, (G, outfeatures), minval=0.005, maxval=0.02,
                                dtype=jnp.float32)
    bias = jax.random.normal(kb, (outfeatures,), dtype=jnp.float32) * 0.1

    # Standard GPTQ buffers (as produced by QuantLinear.pack) ...
    qweight_std_np = _pack_4bit_rows(np.asarray(intweight))           # (Kp, N) int32
    qzeros_np = _pack_4bit_cols(np.asarray(zeros_m1))                 # (G, N//8) int32
    # ... and the one-time TPU relayout of the weights.
    qweight_tpu = jnp.asarray(repack_qweight_nibble_major(qweight_std_np))
    qweight_std = jnp.asarray(qweight_std_np)
    qzeros = jnp.asarray(qzeros_np)

    out = quant_linear_forward(x, qweight_tpu, qzeros, scales, bias, groupsize)
    out = jax.block_until_ready(out)

    # Pure-JAX reference mirroring the torch dequant path in TPU half precision:
    # (w - zero) * scale in bf16, bf16 matmul with f32 accumulation, f32 bias.
    shifts = jnp.arange(PACK, dtype=jnp.int32) * BITS
    w_unp = jnp.bitwise_and(
        jnp.right_shift(qweight_std[:, None, :], shifts[None, :, None]), MASK)
    w_full = w_unp.reshape(infeatures, outfeatures)
    z_unp = jnp.bitwise_and(
        jnp.right_shift(qzeros[:, :, None], shifts[None, None, :]), MASK) + 1
    zeros_full = z_unp.reshape(G, outfeatures)
    g_idx = jnp.arange(infeatures) // groupsize
    weights_ref = ((w_full.astype(jnp.bfloat16)
                    - zeros_full.astype(jnp.bfloat16)[g_idx])
                   * scales.astype(jnp.bfloat16)[g_idx])
    ref = (jnp.dot(x.reshape(-1, infeatures).astype(jnp.bfloat16), weights_ref,
                   preferred_element_type=jnp.float32)
           + bias).astype(jnp.bfloat16).reshape(out.shape)

    assert out.shape == (2, 40, outfeatures), out.shape
    err = float(jnp.max(jnp.abs(out.astype(jnp.float32) - ref.astype(jnp.float32))))
    assert jnp.allclose(out.astype(jnp.float32), ref.astype(jnp.float32),
                        rtol=1e-2, atol=1e-2), err

    print("KERNEL_OK")
</pallas_src>

<mosaic_0001>
module attributes {stable_mosaic.version = 11 : i64} {
  func.func @_quantlinear_kernel(%arg0: i32, %arg1: i32, %arg2: memref<80x128xbf16, #tpu.memory_space<vmem>>, %arg3: memref<16x256xi32, #tpu.memory_space<vmem>>, %arg4: memref<4x256xbf16, #tpu.memory_space<vmem>>, %arg5: memref<4x256xbf16, #tpu.memory_space<vmem>>, %arg6: memref<1x256xf32, #tpu.memory_space<vmem>>, %arg7: memref<80x256xbf16, #tpu.memory_space<vmem>>, %arg8: memref<128x256xbf16, #tpu.memory_space<vmem>>) attributes {dimension_semantics = [#tpu.dimension_semantics<parallel>, #tpu.dimension_semantics<arbitrary>], iteration_bounds = array<i64: 1, 1>, scalar_prefetch = 0 : i64, scratch_operands = 1 : i64, tpu.core_type = #tpu.core_type<tc>, window_params = [{transform_indices = @transform_0, window_bounds = array<i64: 80, 128>}, {transform_indices = @transform_1, window_bounds = array<i64: 16, 256>}, {transform_indices = @transform_2, window_bounds = array<i64: 4, 256>}, {transform_indices = @transform_3, window_bounds = array<i64: 4, 256>}, {transform_indices = @transform_4, window_bounds = array<i64: 1, 256>}, {transform_indices = @transform_5, window_bounds = array<i64: 80, 256>}]} {
    %c0_i32 = arith.constant 0 : i32
    %0 = arith.cmpi eq, %arg1, %c0_i32 : i32
    %1 = arith.extui %0 : i1 to i32
    %c0_i32_0 = arith.constant 0 : i32
    %2 = arith.cmpi ne, %1, %c0_i32_0 : i32
    scf.if %2 {
      %c0_8 = arith.constant 0 : index
      %c0_9 = arith.constant 0 : index
      %11 = vector.load %arg3[%c0_8, %c0_9] : memref<16x256xi32, #tpu.memory_space<vmem>>, vector<16x256xi32>
      %12 = tpu.bitcast %11 : vector<16x256xi32> -> vector<16x256xi32>
      %c0_10 = arith.constant 0 : index
      %c0_11 = arith.constant 0 : index
      %13 = vector.load %arg4[%c0_10, %c0_11] : memref<4x256xbf16, #tpu.memory_space<vmem>>, vector<4x256xbf16>
      %c0_12 = arith.constant 0 : index
      %c0_13 = arith.constant 0 : index
      %14 = vector.load %arg5[%c0_12, %c0_13] : memref<4x256xbf16, #tpu.memory_space<vmem>>, vector<4x256xbf16>
      %c15_i32 = arith.constant 15 : i32
      %15 = vector.broadcast %c15_i32 : i32 to vector<16x256xi32>
      %16 = arith.andi %12, %15 : vector<16x256xi32>
      %17 = tpu.bitcast %16 : vector<16x256xi32> -> vector<16x256xi32>
      %18 = arith.sitofp %17 : vector<16x256xi32> to vector<16x256xbf16>
      %19 = vector.extract_strided_slice %14 {offsets = [0, 0], sizes = [1, 256], strides = [1, 1]} : vector<4x256xbf16> to vector<1x256xbf16>
      %20 = vector.broadcast %19 : vector<1x256xbf16> to vector<16x256xbf16>
      %21 = arith.subf %18, %20 : vector<16x256xbf16>
      %22 = vector.extract_strided_slice %13 {offsets = [0, 0], sizes = [1, 256], strides = [1, 1]} : vector<4x256xbf16> to vector<1x256xbf16>
      %23 = vector.broadcast %22 : vector<1x256xbf16> to vector<16x256xbf16>
      %24 = arith.mulf %21, %23 : vector<16x256xbf16>
      %c0_14 = arith.constant 0 : index
      %c0_15 = arith.constant 0 : index
      %25 = vector.load %arg8[%c0_14, %c0_15] : memref<128x256xbf16, #tpu.memory_space<vmem>>, vector<16x256xbf16>
      tpu.vector_store %arg8[%c0_14, %c0_15], %24 {strides = array<i32>} : memref<128x256xbf16, #tpu.memory_space<vmem>>, vector<16x256xbf16>,
      %c4_i32 = arith.constant 4 : i32
      %26 = vector.broadcast %c4_i32 : i32 to vector<16x256xi32>
      %27 = arith.shrui %12, %26 : vector<16x256xi32>
      %c15_i32_16 = arith.constant 15 : i32
      %28 = vector.broadcast %c15_i32_16 : i32 to vector<16x256xi32>
      %29 = arith.andi %27, %28 : vector<16x256xi32>
      %30 = tpu.bitcast %29 : vector<16x256xi32> -> vector<16x256xi32>
      %31 = arith.sitofp %30 : vector<16x256xi32> to vector<16x256xbf16>
      %32 = vector.extract_strided_slice %14 {offsets = [0, 0], sizes = [1, 256], strides = [1, 1]} : vector<4x256xbf16> to vector<1x256xbf16>
      %33 = vector.broadcast %32 : vector<1x256xbf16> to vector<16x256xbf16>
      %34 = arith.subf %31, %33 : vector<16x256xbf16>
      %35 = vector.extract_strided_slice %13 {offsets = [0, 0], sizes = [1, 256], strides = [1, 1]} : vector<4x256xbf16> to vector<1x256xbf16>
      %36 = vector.broadcast %35 : vector<1x256xbf16> to vector<16x256xbf16>
      %37 = arith.mulf %34, %36 : vector<16x256xbf16>
      %c16 = arith.constant 16 : index
      %c0_17 = arith.constant 0 : index
      %38 = vector.load %arg8[%c16, %c0_17] : memref<128x256xbf16, #tpu.memory_space<vmem>>, vector<16x256xbf16>
      tpu.vector_store %arg8[%c16, %c0_17], %37 {strides = array<i32>} : memref<128x256xbf16, #tpu.memory_space<vmem>>, vector<16x256xbf16>,
      %c8_i32 = arith.constant 8 : i32
      %39 = vector.broadcast %c8_i32 : i32 to vector<16x256xi32>
      %40 = arith.shrui %12, %39 : vector<16x256xi32>
      %c15_i32_18 = arith.constant 15 : i32
      %41 = vector.broadcast %c15_i32_18 : i32 to vector<16x256xi32>
      %42 = arith.andi %40, %41 : vector<16x256xi32>
      %43 = tpu.bitcast %42 : vector<16x256xi32> -> vector<16x256xi32>
      %44 = arith.sitofp %43 : vector<16x256xi32> to vector<16x256xbf16>
      %45 = vector.extract_strided_slice %14 {offsets = [1, 0], sizes = [1, 256], strides = [1, 1]} : vector<4x256xbf16> to vector<1x256xbf16>
      %46 = vector.broadcast %45 : vector<1x256xbf16> to vector<16x256xbf16>
      %47 = arith.subf %44, %46 : vector<16x256xbf16>
      %48 = vector.extract_strided_slice %13 {offsets = [1, 0], sizes = [1, 256], strides = [1, 1]} : vector<4x256xbf16> to vector<1x256xbf16>
      %49 = vector.broadcast %48 : vector<1x256xbf16> to vector<16x256xbf16>
      %50 = arith.mulf %47, %49 : vector<16x256xbf16>
      %c32 = arith.constant 32 : index
      %c0_19 = arith.constant 0 : index
      %51 = vector.load %arg8[%c32, %c0_19] : memref<128x256xbf16, #tpu.memory_space<vmem>>, vector<16x256xbf16>
      tpu.vector_store %arg8[%c32, %c0_19], %50 {strides = array<i32>} : memref<128x256xbf16, #tpu.memory_space<vmem>>, vector<16x256xbf16>,
      %c12_i32 = arith.constant 12 : i32
      %52 = vector.broadcast %c12_i32 : i32 to vector<16x256xi32>
      %53 = arith.shrui %12, %52 : vector<16x256xi32>
      %c15_i32_20 = arith.constant 15 : i32
      %54 = vector.broadcast %c15_i32_20 : i32 to vector<16x256xi32>
      %55 = arith.andi %53, %54 : vector<16x256xi32>
      %56 = tpu.bitcast %55 : vector<16x256xi32> -> vector<16x256xi32>
      %57 = arith.sitofp %56 : vector<16x256xi32> to vector<16x256xbf16>
      %58 = vector.extract_strided_slice %14 {offsets = [1, 0], sizes = [1, 256], strides = [1, 1]} : vector<4x256xbf16> to vector<1x256xbf16>
      %59 = vector.broadcast %58 : vector<1x256xbf16> to vector<16x256xbf16>
      %60 = arith.subf %57, %59 : vector<16x256xbf16>
      %61 = vector.extract_strided_slice %13 {offsets = [1, 0], sizes = [1, 256], strides = [1, 1]} : vector<4x256xbf16> to vector<1x256xbf16>
      %62 = vector.broadcast %61 : vector<1x256xbf16> to vector<16x256xbf16>
      %63 = arith.mulf %60, %62 : vector<16x256xbf16>
      %c48 = arith.constant 48 : index
      %c0_21 = arith.constant 0 : index
      %64 = vector.load %arg8[%c48, %c0_21] : memref<128x256xbf16, #tpu.memory_space<vmem>>, vector<16x256xbf16>
      tpu.vector_store %arg8[%c48, %c0_21], %63 {strides = array<i32>} : memref<128x256xbf16, #tpu.memory_space<vmem>>, vector<16x256xbf16>,
      %c16_i32 = arith.constant 16 : i32
      %65 = vector.broadcast %c16_i32 : i32 to vector<16x256xi32>
      %66 = arith.shrui %12, %65 : vector<16x256xi32>
      %c15_i32_22 = arith.constant 15 : i32
      %67 = vector.broadcast %c15_i32_22 : i32 to vector<16x256xi32>
      %68 = arith.andi %66, %67 : vector<16x256xi32>
      %69 = tpu.bitcast %68 : vector<16x256xi32> -> vector<16x256xi32>
      %70 = arith.sitofp %69 : vector<16x256xi32> to vector<16x256xbf16>
      %71 = vector.extract_strided_slice %14 {offsets = [2, 0], sizes = [1, 256], strides = [1, 1]} : vector<4x256xbf16> to vector<1x256xbf16>
      %72 = vector.broadcast %71 : vector<1x256xbf16> to vector<16x256xbf16>
      %73 = arith.subf %70, %72 : vector<16x256xbf16>
      %74 = vector.extract_strided_slice %13 {offsets = [2, 0], sizes = [1, 256], strides = [1, 1]} : vector<4x256xbf16> to vector<1x256xbf16>
      %75 = vector.broadcast %74 : vector<1x256xbf16> to vector<16x256xbf16>
      %76 = arith.mulf %73, %75 : vector<16x256xbf16>
      %c64 = arith.constant 64 : index
      %c0_23 = arith.constant 0 : index
      %77 = vector.load %arg8[%c64, %c0_23] : memref<128x256xbf16, #tpu.memory_space<vmem>>, vector<16x256xbf16>
      tpu.vector_store %arg8[%c64, %c0_23], %76 {strides = array<i32>} : memref<128x256xbf16, #tpu.memory_space<vmem>>, vector<16x256xbf16>,
      %c20_i32 = arith.constant 20 : i32
      %78 = vector.broadcast %c20_i32 : i32 to vector<16x256xi32>
      %79 = arith.shrui %12, %78 : vector<16x256xi32>
      %c15_i32_24 = arith.constant 15 : i32
      %80 = vector.broadcast %c15_i32_24 : i32 to vector<16x256xi32>
      %81 = arith.andi %79, %80 : vector<16x256xi32>
      %82 = tpu.bitcast %81 : vector<16x256xi32> -> vector<16x256xi32>
      %83 = arith.sitofp %82 : vector<16x256xi32> to vector<16x256xbf16>
      %84 = vector.extract_strided_slice %14 {offsets = [2, 0], sizes = [1, 256], strides = [1, 1]} : vector<4x256xbf16> to vector<1x256xbf16>
      %85 = vector.broadcast %84 : vector<1x256xbf16> to vector<16x256xbf16>
      %86 = arith.subf %83, %85 : vector<16x256xbf16>
      %87 = vector.extract_strided_slice %13 {offsets = [2, 0], sizes = [1, 256], strides = [1, 1]} : vector<4x256xbf16> to vector<1x256xbf16>
      %88 = vector.broadcast %87 : vector<1x256xbf16> to vector<16x256xbf16>
      %89 = arith.mulf %86, %88 : vector<16x256xbf16>
      %c80 = arith.constant 80 : index
      %c0_25 = arith.constant 0 : index
      %90 = vector.load %arg8[%c80, %c0_25] : memref<128x256xbf16, #tpu.memory_space<vmem>>, vector<16x256xbf16>
      tpu.vector_store %arg8[%c80, %c0_25], %89 {strides = array<i32>} : memref<128x256xbf16, #tpu.memory_space<vmem>>, vector<16x256xbf16>,
      %c24_i32 = arith.constant 24 : i32
      %91 = vector.broadcast %c24_i32 : i32 to vector<16x256xi32>
      %92 = arith.shrui %12, %91 : vector<16x256xi32>
      %c15_i32_26 = arith.constant 15 : i32
      %93 = vector.broadcast %c15_i32_26 : i32 to vector<16x256xi32>
      %94 = arith.andi %92, %93 : vector<16x256xi32>
      %95 = tpu.bitcast %94 : vector<16x256xi32> -> vector<16x256xi32>
      %96 = arith.sitofp %95 : vector<16x256xi32> to vector<16x256xbf16>
      %97 = vector.extract_strided_slice %14 {offsets = [3, 0], sizes = [1, 256], strides = [1, 1]} : vector<4x256xbf16> to vector<1x256xbf16>
      %98 = vector.broadcast %97 : vector<1x256xbf16> to vector<16x256xbf16>
      %99 = arith.subf %96, %98 : vector<16x256xbf16>
      %100 = vector.extract_strided_slice %13 {offsets = [3, 0], sizes = [1, 256], strides = [1, 1]} : vector<4x256xbf16> to vector<1x256xbf16>
      %101 = vector.broadcast %100 : vector<1x256xbf16> to vector<16x256xbf16>
      %102 = arith.mulf %99, %101 : vector<16x256xbf16>
      %c96 = arith.constant 96 : index
      %c0_27 = arith.constant 0 : index
      %103 = vector.load %arg8[%c96, %c0_27] : memref<128x256xbf16, #tpu.memory_space<vmem>>, vector<16x256xbf16>
      tpu.vector_store %arg8[%c96, %c0_27], %102 {strides = array<i32>} : memref<128x256xbf16, #tpu.memory_space<vmem>>, vector<16x256xbf16>,
      %c28_i32 = arith.constant 28 : i32
      %104 = vector.broadcast %c28_i32 : i32 to vector<16x256xi32>
      %105 = arith.shrui %12, %104 : vector<16x256xi32>
      %106 = tpu.bitcast %105 : vector<16x256xi32> -> vector<16x256xi32>
      %107 = arith.sitofp %106 : vector<16x256xi32> to vector<16x256xbf16>
      %108 = vector.extract_strided_slice %14 {offsets = [3, 0], sizes = [1, 256], strides = [1, 1]} : vector<4x256xbf16> to vector<1x256xbf16>
      %109 = vector.broadcast %108 : vector<1x256xbf16> to vector<16x256xbf16>
      %110 = arith.subf %107, %109 : vector<16x256xbf16>
      %111 = vector.extract_strided_slice %13 {offsets = [3, 0], sizes = [1, 256], strides = [1, 1]} : vector<4x256xbf16> to vector<1x256xbf16>
      %112 = vector.broadcast %111 : vector<1x256xbf16> to vector<16x256xbf16>
      %113 = arith.mulf %110, %112 : vector<16x256xbf16>
      %c112 = arith.constant 112 : index
      %c0_28 = arith.constant 0 : index
      %114 = vector.load %arg8[%c112, %c0_28] : memref<128x256xbf16, #tpu.memory_space<vmem>>, vector<16x256xbf16>
      tpu.vector_store %arg8[%c112, %c0_28], %113 {strides = array<i32>} : memref<128x256xbf16, #tpu.memory_space<vmem>>, vector<16x256xbf16>,
    } else {
    }
    %c0 = arith.constant 0 : index
    %c0_1 = arith.constant 0 : index
    %3 = vector.load %arg2[%c0, %c0_1] : memref<80x128xbf16, #tpu.memory_space<vmem>>, vector<80x128xbf16>
    %c0_2 = arith.constant 0 : index
    %c0_3 = arith.constant 0 : index
    %4 = vector.load %arg8[%c0_2, %c0_3] : memref<128x256xbf16, #tpu.memory_space<vmem>>, vector<128x256xbf16>
    %cst = arith.constant dense<0.000000e+00> : vector<80x256xf32>
    %5 = tpu.matmul %3, %4, %cst {dimension_numbers = #tpu.dot_dimension_numbers<[1], [0], [0], [1], [0, 0, 1, 1], [], []>} : vector<80x128xbf16>, vector<128x256xbf16>, vector<80x256xf32> -> vector<80x256xf32>
    %c0_4 = arith.constant 0 : index
    %c0_5 = arith.constant 0 : index
    %6 = vector.load %arg6[%c0_4, %c0_5] : memref<1x256xf32, #tpu.memory_space<vmem>>, vector<1x256xf32>
    %7 = vector.broadcast %6 : vector<1x256xf32> to vector<80x256xf32>
    %8 = arith.addf %5, %7 : vector<80x256xf32>
    %9 = arith.truncf %8 : vector<80x256xf32> to vector<80x256xbf16>
    %c0_6 = arith.constant 0 : index
    %c0_7 = arith.constant 0 : index
    %10 = vector.load %arg7[%c0_6, %c0_7] : memref<80x256xbf16, #tpu.memory_space<vmem>>, vector<80x256xbf16>
    tpu.vector_store %arg7[%c0_6, %c0_7], %9 {strides = array<i32>} : memref<80x256xbf16, #tpu.memory_space<vmem>>, vector<80x256xbf16>,
    return
  }
  func.func @transform_0(%arg0: i32, %arg1: i32) -> (i32, i32) {
    %c0_i32 = arith.constant 0 : i32
    %c0_i32_0 = arith.constant 0 : i32
    return %arg1, %c0_i32 : i32, i32
  }
  func.func @transform_1(%arg0: i32, %arg1: i32) -> (i32, i32) {
    %c0_i32 = arith.constant 0 : i32
    %c0_i32_0 = arith.constant 0 : i32
    return %c0_i32, %arg0 : i32, i32
  }
  func.func @transform_2(%arg0: i32, %arg1: i32) -> (i32, i32) {
    %c0_i32 = arith.constant 0 : i32
    %c0_i32_0 = arith.constant 0 : i32
    return %c0_i32, %arg0 : i32, i32
  }
  func.func @transform_3(%arg0: i32, %arg1: i32) -> (i32, i32) {
    %c0_i32 = arith.constant 0 : i32
    %c0_i32_0 = arith.constant 0 : i32
    return %c0_i32, %arg0 : i32, i32
  }
  func.func @transform_4(%arg0: i32, %arg1: i32) -> (i32, i32) {
    %c0_i32 = arith.constant 0 : i32
    %c0_i32_0 = arith.constant 0 : i32
    return %c0_i32, %arg0 : i32, i32
  }
  func.func @transform_5(%arg0: i32, %arg1: i32) -> (i32, i32) {
    %c0_i32 = arith.constant 0 : i32
    return %arg1, %arg0 : i32, i32
  }
}

</mosaic_0001>

<bundles_post_ra>
// kernel: tpu_custom_call.1
= control target key start
LH: loop header
LB: loop body
LE: loop exit
PB: predicated region body
PF: predicated region fallthrough
CT: control target
= control target key end

     0   :  { %10 = vsyncpa [#allocation4], 0  ;;  %s897_s0 = inlined_call_operand.hbm [shape: bf16[80,128], index: 0, kind: input, shape index: {}]   ;;  %s898_s1 = inlined_call_operand.hbm [shape: s32[16,256], index: 1, kind: input, shape index: {}]   ;;  %s899_s2 = inlined_call_operand.vmem [shape: bf16[4,256], index: 2, kind: input, shape index: {}]   ;;  %s900_s3 = inlined_call_operand.vmem [shape: bf16[4,256], index: 3, kind: input, shape index: {}]   ;;  %s901_s4 = inlined_call_operand.vmem [shape: f32[1,256], index: 4, kind: input, shape index: {}]   ;;  %s902_s5 = inlined_call_operand.hbm [shape: bf16[80,256], index: 5, kind: output, shape index: {}]  }
   0x1   :  { %11 = vsyncpa [#allocation7], 0 }
   0x2   :  { %12 = vsyncpa [#allocation5], 0  ;;  %s687_s18 = smov [#allocation3]   ;;  %s615_s22 = scalar_lea.hbm %s897_s0, 640 }
   0x3   :  { %s18_s19 = sshll.u32 %s687_s18, 4  ;;  %p616_p0 = scmp.ne.s32.totalorder %s897_s0, %s615_s22  ;;  %s19_s19 = int_to_ptr.vmem [resolvable:$true] %s18_s19 }
   0x4   :  { %p619_p1 = scmp.lt.u32.totalorder %s615_s22, %s897_s0 }
   0x6   :  { %p621_p2 = pnand %p619_p1, %p616_p0 }
   0x8   :  { %624 = shalt.err (!%p621_p2)
}
   0x9   :  { %s625_s27 = scalar_lea.vmem %s19_s19, 640  ;;  %p630_p4 = scmp.lt.s32.totalorder %s19_s19, %s19_s19 }
   0xa   :  { %p626_p3 = scmp.ne.s32.totalorder %s19_s19, %s625_s27  ;;  %p631_p5 = scmp.lt.s32.totalorder %s625_s27, %s625_s27 }
   0xc   :  { %p632_p6 = por %p631_p5, %p630_p4 }
   0xe   :  { %p633_p7 = pnand %p632_p6, %p626_p3 }
  0x10   :  { %636 = shalt.err (!%p633_p7)
}
  0x11   :  { %s688_s28 = smov 64   ;;  %s689_s29 = smov 4  }
  0x12   :  { %24 = dma.hbm_to_vmem [thread:$0]  %s897_s0, 640, %s19_s19, [#allocation4], %s688_s28, %s688_s28, %s689_s29  }
  0x13   :  { %s690_s7 = smov [#allocation6]   ;;  %s637_s11 = scalar_lea.hbm %s898_s1, 512 }
  0x14   :  { %s30_s8 = sshll.u32 %s690_s7, 4  ;;  %p638_p8 = scmp.ne.s32.totalorder %s898_s1, %s637_s11  ;;  %s31_s8 = int_to_ptr.vmem [resolvable:$true] %s30_s8 }
  0x15   :  { %p641_p9 = scmp.lt.u32.totalorder %s637_s11, %s898_s1 }
  0x17   :  { %p643_p10 = pnand %p641_p9, %p638_p8 }
  0x19   :  { %646 = shalt.err (!%p643_p10)
}
  0x1a   :  { %s647_s16 = scalar_lea.vmem %s31_s8, 512  ;;  %p652_p12 = scmp.lt.s32.totalorder %s31_s8, %s31_s8 }
  0x1b   :  { %p648_p11 = scmp.ne.s32.totalorder %s31_s8, %s647_s16  ;;  %p653_p13 = scmp.lt.s32.totalorder %s647_s16, %s647_s16 }
  0x1d   :  { %p654_p0 = por %p653_p13, %p652_p12 }
  0x1f   :  { %p655_p1 = pnand %p654_p0, %p648_p11 }
  0x21   :  { %658 = shalt.err (!%p655_p1)
}
  0x22   :  { %s691_s0 = smov 256   ;;  %s692_s17 = smov 16  }
  0x23   :  { %36 = dma.hbm_to_vmem [thread:$0]  %s898_s1, 512, %s31_s8, [#allocation7], %s691_s0, %s691_s0, %s692_s17  }
  0x24   :  { %681 = dma.done.wait [#allocation4], 640  }
  0x25   :  { %682 = vsyncadd [#allocation4], 4294966656 }
  0x26   :  { %683 = dma.done.wait [#allocation7], 512  }
  0x27   :  { %684 = vsyncadd [#allocation7], 4294966784  ;;  %v82_v0 = vlaneseq  ;;  %v693_v1 = vmov 0   ;;  %v757_v5 = vld [vmem:[#allocation6 + $0x8] sm:$0xff]  ;;  %v759_v6 = vld [vmem:[#allocation6 + $0x18] sm:$0xff] }
  0x28   :  { %418 = vmatprep.mubr.bf16.mxu0 %v693_v1  ;;  %448 = vmatprep.mubr.bf16.mxu1 %v693_v1  ;;  %v764_v7 = vld.sshfl [vmem:[%s899_s2] sm:$0x33 pattern:$0x76325410]  ;;  %v61_v9 = vand.u32 15, %v757_v5  ;;  %v63_v10 = vand.u32 15, %v759_v6 }
  0x29   :  { %v83_v2 = vshrl.u32 %v82_v0, 7  ;;  %v769_v8 = vld.sshfl [vmem:[%s900_s3] sm:$0x33 pattern:$0x76325410]  ;;  %v103_v11 = vcombine.high %v764_v7, %v764_v7  ;;  %v777_v12 = vpack.i.b16 %v764_v7, %v764_v7  ;;  %v781_v14 = vld [vmem:[#allocation6] sm:$0xff] }
  0x2a   :  { %v78_v13 = vcombine.high %v769_v8, %v769_v8  ;;  %v783_v15 = vld [vmem:[#allocation6 + $0x10] sm:$0xff]  ;;  %v787_v16 = vpack.i.b16 %v769_v8, %v769_v8  ;;  %v123_v17 = vshrl.u32 %v757_v5, 4  ;;  %v125_v18 = vshrl.u32 %v759_v6, 4 }
  0x2b   :  { %v753_v3 = vsub.s32 0, %v83_v2  ;;  %v755_v4 = vsub.s32 1, %v83_v2  ;;  %v65_v19 = vcvt.s32.f32 %v61_v9  ;;  %v67_v20 = vcvt.s32.f32 %v63_v10 }
  0x2c   :  { %v791_v21 = vpack.i.b16 %v103_v11, %v103_v11  ;;  %v60_v22 = vand.u32 15, %v781_v14  ;;  %v794_v23 = vpack.i.b16 %v78_v13, %v78_v13  ;;  %v62_v24 = vand.u32 15, %v783_v15 }
  0x2d   :  { %v85_v25 = vrot.slane %v787_v16, %v753_v3  ;;  %v110_v26 = vrot.slane %v777_v12, %v753_v3  ;;  %v69_v27 = vpack.c.bf16 %v67_v20, %v65_v19  ;;  %v127_v30 = vand.u32 15, %v123_v17 }
  0x2e   :  { %v117_v28 = vrot.slane %v791_v21, %v753_v3  ;;  %v64_v29 = vcvt.s32.f32 %v60_v22  ;;  %v92_v31 = vrot.slane %v794_v23, %v753_v3  ;;  %v66_v32 = vcvt.s32.f32 %v62_v24 }
  0x2f   :  { %v129_v33 = vand.u32 15, %v125_v18  ;;  %v122_v34 = vshrl.u32 %v781_v14, 4  ;;  %v131_v35 = vcvt.s32.f32 %v127_v30  ;;  %v124_v36 = vshrl.u32 %v783_v15, 4 }
  0x30   :  { %v143_v37 = vshrl.u32 %v757_v5, 8  ;;  %v145_v38 = vshrl.u32 %v759_v6, 8  ;;  %v94_v39 = vsub.bf16 %v69_v27, %v92_v31  ;;  %v68_v40 = vpack.c.bf16 %v66_v32, %v64_v29 }
  0x31   :  { %v133_v41 = vcvt.s32.f32 %v129_v33  ;;  %v126_v42 = vand.u32 15, %v122_v34  ;;  %v128_v43 = vand.u32 15, %v124_v36  ;;  %v163_v46 = vshrl.u32 %v78_v13, 16 }
  0x32   :  { %v147_v44 = vand.u32 15, %v143_v37  ;;  %v149_v45 = vand.u32 15, %v145_v38  ;;  %v119_v47 = vmul.bf16 %v117_v28, %v94_v39  ;;  %v93_v48 = vsub.bf16 %v68_v40, %v85_v25 }
  0x33   :  { %v135_v49 = vpack.c.bf16 %v133_v41, %v131_v35  ;;  %v130_v50 = vcvt.s32.f32 %v126_v42  ;;  %v132_v51 = vcvt.s32.f32 %v128_v43  ;;  %v809_v54 = vpack.i.b16 %v163_v46, %v163_v46 }
  0x34   :  { %v151_v52 = vcvt.s32.f32 %v147_v44  ;;  %v153_v53 = vcvt.s32.f32 %v149_v45  ;;  %386 = vmatprep.subr.bf16.mxu0 %v119_v47  ;;  %v118_v55 = vmul.bf16 %v110_v26, %v93_v48  ;;  %584 = vmatprep.subr.bf16.mxu1 %v119_v47  ;;  %v179_v57 = vshrl.u32 %v103_v11, 16 }
  0x35   :  { %v137_v56 = vsub.bf16 %v135_v49, %v92_v31  ;;  %v142_v58 = vshrl.u32 %v781_v14, 8  ;;  %v134_v59 = vpack.c.bf16 %v132_v51, %v130_v50  ;;  %v814_v61 = vrot.slane %v809_v54, %v753_v3 }
  0x36   :  { %v155_v60 = vpack.c.bf16 %v153_v53, %v151_v52  ;;  %v144_v62 = vshrl.u32 %v783_v15, 8  ;;  %387 = vmatpush1.bf16.msra.mxu0 %v118_v55  ;;  %592 = vmatpush1.bf16.msra.mxu1 %v118_v55  ;;  %v817_v0 = vpack.i.b16 %v179_v57, %v179_v57  ;;  %v156_v9 = vshrl.u32 %v769_v8, 16 }
  0x37   :  { %v139_v63 = vmul.bf16 %v137_v56, %v117_v28  ;;  %v146_v2 = vand.u32 15, %v142_v58  ;;  %v136_v10 = vsub.bf16 %v134_v59, %v85_v25  ;;  %v172_v17 = vshrl.u32 %v764_v7, 16 }
  0x38   :  { %v171_v11 = vsub.bf16 %v155_v60, %v814_v61  ;;  %v148_v13 = vand.u32 15, %v144_v62  ;;  %v185_v18 = vrot.slane %v817_v0, %v753_v3  ;;  %v824_v20 = vpack.i.b16 %v156_v9, %v156_v9 }
  0x39   :  { %388 = vmatprep.subr.bf16.mxu0 %v139_v63  ;;  %585 = vmatprep.subr.bf16.mxu1 %v139_v63  ;;  %v150_v19 = vcvt.s32.f32 %v146_v2  ;;  %v191_v22 = vshrl.u32 %v757_v5, 12  ;;  %v138_v24 = vmul.bf16 %v136_v10, %v110_v26  ;;  %v827_v28 = vpack.i.b16 %v172_v17, %v172_v17 }
  0x3a   :  { %v152_v27 = vcvt.s32.f32 %v148_v13  ;;  %v193_v8 = vshrl.u32 %v759_v6, 12  ;;  %v187_v25 = vmul.bf16 %v185_v18, %v171_v11  ;;  %v162_v7 = vrot.slane %v824_v20, %v753_v3 }
  0x3b   :  { %v195_v29 = vand.u32 15, %v191_v22  ;;  %v190_v30 = vshrl.u32 %v781_v14, 12  ;;  %389 = vmatpush1.bf16.msra.mxu0 %v138_v24  ;;  %v178_v32 = vrot.slane %v827_v28, %v753_v3  ;;  %593 = vmatpush1.bf16.msra.mxu1 %v138_v24  ;;  %v192_v26 = vshrl.u32 %v783_v15, 12 }
  0x3c   :  { %v154_v31 = vpack.c.bf16 %v152_v27, %v150_v19  ;;  %v197_v33 = vand.u32 15, %v193_v8  ;;  %390 = vmatprep.subr.bf16.mxu0 %v187_v25  ;;  %586 = vmatprep.subr.bf16.mxu1 %v187_v25  ;;  %v211_v36 = vshrl.u32 %v757_v5, 16  ;;  %v213_v37 = vshrl.u32 %v759_v6, 16 }
  0x3d   :  { %v199_v34 = vcvt.s32.f32 %v195_v29  ;;  %v194_v35 = vand.u32 15, %v190_v30  ;;  %v196_v40 = vand.u32 15, %v192_v26  ;;  %v840_v41 = vrot.slane %v794_v23, %v755_v4 }
  0x3e   :  { %v170_v38 = vsub.bf16 %v154_v31, %v162_v7  ;;  %v201_v39 = vcvt.s32.f32 %v197_v33  ;;  %v215_v43 = vand.u32 15, %v211_v36  ;;  %v217_v44 = vand.u32 15, %v213_v37 }
  0x3f   :  { %v198_v42 = vcvt.s32.f32 %v194_v35  ;;  %v241_v45 = vrot.slane %v791_v21, %v755_v4  ;;  %v200_v48 = vcvt.s32.f32 %v196_v40  ;;  %v210_v49 = vshrl.u32 %v781_v14, 16 }
  0x40   :  { %v186_v46 = vmul.bf16 %v178_v32, %v170_v38  ;;  %v203_v47 = vpack.c.bf16 %v201_v39, %v199_v34  ;;  %v219_v50 = vcvt.s32.f32 %v215_v43  ;;  %v221_v51 = vcvt.s32.f32 %v217_v44 }
  0x41   :  { %v212_v52 = vshrl.u32 %v783_v15, 16  ;;  %v848_v53 = vrot.slane %v787_v16, %v755_v4  ;;  %v202_v55 = vpack.c.bf16 %v200_v48, %v198_v42  ;;  %v214_v56 = vand.u32 15, %v210_v49 }
  0x42   :  { %391 = vmatpush1.bf16.msra.mxu0 %v186_v46  ;;  %v205_v23 = vsub.bf16 %v203_v47, %v814_v61  ;;  %594 = vmatpush1.bf16.msra.mxu1 %v186_v46  ;;  %v237_v21 = vrot.slane %v777_v12, %v755_v4  ;;  %v223_v57 = vpack.c.bf16 %v221_v51, %v219_v50  ;;  %v247_v59 = vshrl.u32 %v757_v5, 20 }
  0x43   :  { %v216_v58 = vand.u32 15, %v212_v52  ;;  %v249_v60 = vshrl.u32 %v759_v6, 20  ;;  %v204_v63 = vsub.bf16 %v202_v55, %v162_v7  ;;  %v218_v2 = vcvt.s32.f32 %v214_v56 }
  0x44   :  { %v207_v62 = vmul.bf16 %v205_v23, %v185_v18  ;;  %v246_v16 = vshrl.u32 %v781_v14, 20  ;;  %v233_v9 = vsub.bf16 %v223_v57, %v840_v41  ;;  %v251_v10 = vand.u32 15, %v247_v59 }
  0x45   :  { %v220_v61 = vcvt.s32.f32 %v216_v58  ;;  %v253_v11 = vand.u32 15, %v249_v60  ;;  %v206_v13 = vmul.bf16 %v204_v63, %v178_v32  ;;  %v248_v12 = vshrl.u32 %v783_v15, 20 }
  0x46   :  { %392 = vmatprep.subr.bf16.mxu0 %v207_v62  ;;  %587 = vmatprep.subr.bf16.mxu1 %v207_v62  ;;  %v250_v17 = vand.u32 15, %v246_v16  ;;  %v267_v19 = vshrl.u32 %v757_v5, 24  ;;  %v243_v22 = vmul.bf16 %v241_v45, %v233_v9  ;;  %v255_v18 = vcvt.s32.f32 %v251_v10  ;;  %v612_v16 = vld [vmem:[#allocation3 + $0x8] sm:$0xff]   ;;  %v613_v9 = vld [vmem:[#allocation3 + $0x20] sm:$0xff]  }
  0x47   :  { %v222_v24 = vpack.c.bf16 %v220_v61, %v218_v2  ;;  %v257_v27 = vcvt.s32.f32 %v253_v11  ;;  %393 = vmatpush1.bf16.msra.mxu0 %v206_v13  ;;  %595 = vmatpush1.bf16.msra.mxu1 %v206_v13  ;;  %v252_v8 = vand.u32 15, %v248_v12  ;;  %v269_v7 = vshrl.u32 %v759_v6, 24  ;;  %v610_v2 = vld [vmem:[#allocation3] sm:$0xff]   ;;  %v614_v61 = vld [vmem:[#allocation3 + $0x10] sm:$0xff]  }
  0x48   :  { %v254_v25 = vcvt.s32.f32 %v250_v17  ;;  %v271_v29 = vand.u32 15, %v267_v19  ;;  %394 = vmatprep.subr.bf16.mxu0 %v243_v22  ;;  %588 = vmatprep.subr.bf16.mxu1 %v243_v22  ;;  %v266_v32 = vshrl.u32 %v781_v14, 24  ;;  %v268_v37 = vshrl.u32 %v783_v15, 24  ;;  %v344_v10 = vld [vmem:[%s901_s4] sm:$0x3]  ;;  %s694_s4 = smov [#allocation8]  }
  0x49   :  { %v232_v30 = vsub.bf16 %v222_v24, %v848_v53  ;;  %v259_v31 = vpack.c.bf16 %v257_v27, %v255_v18  ;;  %v256_v33 = vcvt.s32.f32 %v252_v8  ;;  %v273_v26 = vand.u32 15, %v269_v7  ;;  %s544_s23 = sshll.u32 %s694_s4, 4  ;;  %s545_s23 = int_to_ptr.vmem [resolvable:$true] %s544_s23 }
  0x4a   :  { %v275_v34 = vcvt.s32.f32 %v271_v29  ;;  %v270_v38 = vand.u32 15, %v266_v32  ;;  %v287_v42 = vrot.slane %v809_v54, %v755_v4  ;;  %v297_v43 = vrot.slane %v817_v0, %v755_v4  ;;  %s659_s24 = scalar_lea.vmem %s545_s23, 1280  ;;  %p664_p3 = scmp.lt.s32.totalorder %s545_s23, %s545_s23 }
  0x4b   :  { %v242_v35 = vmul.bf16 %v237_v21, %v232_v30  ;;  %v261_v36 = vsub.bf16 %v259_v31, %v840_v41  ;;  %v258_v39 = vpack.c.bf16 %v256_v33, %v254_v25  ;;  %v277_v40 = vcvt.s32.f32 %v273_v26  ;;  %p660_p2 = scmp.ne.s32.totalorder %s545_s23, %s659_s24  ;;  %p665_p4 = scmp.lt.s32.totalorder %s659_s24, %s659_s24 }
  0x4c   :  { %v272_v46 = vand.u32 15, %v268_v37  ;;  %v274_v47 = vcvt.s32.f32 %v270_v38  ;;  %v303_v48 = vshrl.u32 %v757_v5, 28  ;;  %v305_v50 = vshrl.u32 %v759_v6, 28 }
  0x4d   :  { %395 = vmatpush1.bf16.msra.mxu0 %v242_v35  ;;  %v263_v44 = vmul.bf16 %v261_v36, %v241_v45  ;;  %596 = vmatpush1.bf16.msra.mxu1 %v242_v35  ;;  %v260_v41 = vsub.bf16 %v258_v39, %v848_v53  ;;  %v279_v49 = vpack.c.bf16 %v277_v40, %v275_v34  ;;  %v302_v51 = vshrl.u32 %v781_v14, 28  ;;  %p666_p5 = por %p665_p4, %p664_p3 }
  0x4e   :  { %v276_v54 = vcvt.s32.f32 %v272_v46  ;;  %v283_v0 = vrot.slane %v824_v20, %v755_v4  ;;  %v307_v52 = vcvt.s32.f32 %v303_v48  ;;  %v304_v45 = vshrl.u32 %v783_v15, 28 }
  0x4f   :  { %396 = vmatprep.subr.bf16.mxu0 %v263_v44  ;;  %589 = vmatprep.subr.bf16.mxu1 %v263_v44  ;;  %v262_v23 = vmul.bf16 %v260_v41, %v237_v21  ;;  %v289_v55 = vsub.bf16 %v279_v49, %v287_v42  ;;  %v309_v56 = vcvt.s32.f32 %v305_v50  ;;  %v306_v5 = vcvt.s32.f32 %v302_v51  ;;  %p667_p6 = pnand %p666_p5, %p660_p2 }
  0x50   :  { %v278_v57 = vpack.c.bf16 %v276_v54, %v274_v47  ;;  %v293_v53 = vrot.slane %v827_v28, %v755_v4  ;;  %v308_v6 = vcvt.s32.f32 %v304_v45  ;;  %v611_v28 = vld [vmem:[#allocation3 + $0x18] sm:$0xff]   ;;  %v349_v11 = vrot.slane %v344_v10, %v753_v3 }
  0x51   :  { %397 = vmatpush1.bf16.msra.mxu0 %v262_v23  ;;  %v299_v14 = vmul.bf16 %v297_v43, %v289_v55  ;;  %597 = vmatpush1.bf16.msra.mxu1 %v262_v23  ;;  %v311_v58 = vpack.c.bf16 %v309_v56, %v307_v52  ;;  %v353_v13 = vrot.slane %v344_v10, %v755_v4 }
  0x52   :  { %v288_v59 = vsub.bf16 %v278_v57, %v283_v0  ;;  %v310_v60 = vpack.c.bf16 %v308_v6, %v306_v5 }
  0x53   :  { %398 = vmatprep.subr.bf16.mxu0 %v299_v14  ;;  %v313_v20 = vsub.bf16 %v311_v58, %v287_v42  ;;  %590 = vmatprep.subr.bf16.mxu1 %v299_v14 }
  0x54   :  { %v298_v62 = vmul.bf16 %v293_v53, %v288_v59  ;;  %v312_v15 = vsub.bf16 %v310_v60, %v283_v0 }
  0x55   :  { %v315_v21 = vmul.bf16 %v313_v20, %v297_v43 }
  0x56   :  { %399 = vmatpush1.bf16.msra.mxu0 %v298_v62  ;;  %v314_v63 = vmul.bf16 %v312_v15, %v293_v53  ;;  %598 = vmatpush1.bf16.msra.mxu1 %v298_v62 }
  0x57   :  { %400 = vmatprep.subr.bf16.mxu0 %v315_v21  ;;  %591 = vmatprep.subr.bf16.mxu1 %v315_v21 }
  0x5a   :  { %401 = vmatpush1.bf16.msra.mxu0 %v314_v63  ;;  %599 = vmatpush1.bf16.msra.mxu1 %v314_v63 }
  0x5d   :  { %419 = vmatmul.mubr.bf16.vlgmr.msra.gmra.mrb[0].mxu0 %v610_v2  ;;  %449 = vmatmul.mubr.bf16.vlgmr.msra.gmra.mrb[0].mxu1 %v611_v28 }
  0x5e   :  { %428 = vmatprep.mubr.bf16.mxu0 %v693_v1  ;;  %458 = vmatprep.mubr.bf16.mxu1 %v693_v1 }
  0x65   :  { %429 = vmatmul.mubr.bf16.gmra.mrb[4].mxu0 %v612_v16  ;;  %459 = vmatmul.mubr.bf16.gmra.mrb[4].mxu1 %v613_v9 }
  0x66   :  { %438 = vmatprep.mubr.bf16.mxu0 %v693_v1 }
  0x6d   :  { %439 = vmatmul.mubr.bf16.gmra.mrb[8].mxu0 %v614_v61 }
 0x130   :  { %v420_v12 = vpop.f32.mrb[0].mxu0  ;;  %v450_v17 = vpop.f32.mrb[0].mxu1 }
 0x131   :  { %v421_v19 = vadd.f32 %v420_v12, %v349_v11  ;;  %v422_v22 = vpop.f32.mrb[1].mxu0  ;;  %v451_v24 = vadd.f32 %v450_v17, %v349_v11  ;;  %v452_v18 = vpop.f32.mrb[1].mxu1 }
 0x132   :  { %v423_v27 = vadd.f32 %v422_v22, %v353_v13  ;;  %v424_v8 = vpop.f32.mrb[2].mxu0  ;;  %v453_v25 = vadd.f32 %v452_v18, %v353_v13  ;;  %v454_v1 = vpop.f32.mrb[2].mxu1 }
 0x133   :  { %v425_v7 = vadd.f32 %v424_v8, %v349_v11  ;;  %v426_v29 = vpop.f32.mrb[3].mxu0  ;;  %v455_v30 = vadd.f32 %v454_v1, %v349_v11  ;;  %v456_v31 = vpop.f32.mrb[3].mxu1 }
 0x134   :  { %v574_v32 = vpack.c.bf16 %v423_v27, %v421_v19  ;;  %v427_v33 = vadd.f32 %v426_v29, %v353_v13  ;;  %v580_v26 = vpack.c.bf16 %v453_v25, %v451_v24  ;;  %v457_v3 = vadd.f32 %v456_v31, %v353_v13 }
 0x136   :  { %529 = vst [vmem:[#allocation8] sm:$0xff] %v574_v32  ;;  %v575_v4 = vpack.c.bf16 %v427_v33, %v425_v7  ;;  %535 = vst [vmem:[#allocation8 + $0x30] sm:$0xff] %v580_v26  ;;  %v581_v34 = vpack.c.bf16 %v457_v3, %v455_v30 }
 0x138   :  { %530 = vst [vmem:[#allocation8 + $0x8] sm:$0xff] %v575_v4  ;;  %v430_v35 = vpop.f32.mrb[4].mxu0  ;;  %536 = vst [vmem:[#allocation8 + $0x38] sm:$0xff] %v581_v34  ;;  %v460_v36 = vpop.f32.mrb[4].mxu1 }
 0x139   :  { %v431_v37 = vadd.f32 %v430_v35, %v349_v11  ;;  %v432_v38 = vpop.f32.mrb[5].mxu0  ;;  %v461_v39 = vadd.f32 %v460_v36, %v349_v11  ;;  %v462_v40 = vpop.f32.mrb[5].mxu1 }
 0x13a   :  { %v433_v42 = vadd.f32 %v432_v38, %v353_v13  ;;  %v434_v43 = vpop.f32.mrb[6].mxu0  ;;  %v463_v44 = vadd.f32 %v462_v40, %v353_v13  ;;  %v464_v46 = vpop.f32.mrb[6].mxu1 }
 0x13b   :  { %v435_v47 = vadd.f32 %v434_v43, %v349_v11  ;;  %v436_v48 = vpop.f32.mrb[7].mxu0  ;;  %v465_v41 = vadd.f32 %v464_v46, %v349_v11  ;;  %v466_v49 = vpop.f32.mrb[7].mxu1 }
 0x13c   :  { %v576_v50 = vpack.c.bf16 %v433_v42, %v431_v37  ;;  %v437_v51 = vadd.f32 %v436_v48, %v353_v13  ;;  %v582_v54 = vpack.c.bf16 %v463_v44, %v461_v39  ;;  %v467_v0 = vadd.f32 %v466_v49, %v353_v13 }
 0x13e   :  { %531 = vst [vmem:[#allocation8 + $0x10] sm:$0xff] %v576_v50  ;;  %v577_v52 = vpack.c.bf16 %v437_v51, %v435_v47  ;;  %537 = vst [vmem:[#allocation8 + $0x40] sm:$0xff] %v582_v54  ;;  %v583_v45 = vpack.c.bf16 %v467_v0, %v465_v41 }
 0x140   :  { %532 = vst [vmem:[#allocation8 + $0x18] sm:$0xff] %v577_v52  ;;  %v440_v23 = vpop.f32.mrb[8].mxu0  ;;  %538 = vst [vmem:[#allocation8 + $0x48] sm:$0xff] %v583_v45 }
 0x141   :  { %v441_v55 = vadd.f32 %v440_v23, %v349_v11  ;;  %v442_v56 = vpop.f32.mrb[9].mxu0 }
 0x142   :  { %v443_v5 = vadd.f32 %v442_v56, %v353_v13  ;;  %v444_v57 = vpop.f32.mrb[10].mxu0 }
 0x143   :  { %v445_v53 = vadd.f32 %v444_v57, %v349_v11  ;;  %v446_v6 = vpop.f32.mrb[11].mxu0 }
 0x144   :  { %v578_v14 = vpack.c.bf16 %v443_v5, %v441_v55  ;;  %v447_v58 = vadd.f32 %v446_v6, %v353_v13 }
 0x146   :  { %533 = vst [vmem:[#allocation8 + $0x20] sm:$0xff] %v578_v14  ;;  %v579_v59 = vpack.c.bf16 %v447_v58, %v445_v53 }
 0x148   :  { %534 = vst [vmem:[#allocation8 + $0x28] sm:$0xff] %v579_v59 }
 0x149   :  { %670 = shalt.err (!%p667_p6)
}
 0x14a   :  { %s671_s27 = scalar_lea.hbm %s902_s5, 1280 }
 0x14b   :  { %p672_p7 = scmp.ne.s32.totalorder %s902_s5, %s671_s27  ;;  %p675_p8 = scmp.lt.u32.totalorder %s671_s27, %s902_s5 }
 0x14d   :  { %p677_p9 = pnand %p675_p8, %p672_p7 }
 0x14f   :  { %680 = shalt.err (!%p677_p9)
}
 0x150   :  { %s695_s7 = smov 128   ;;  %s696_s8 = smov 8  }
 0x151   :  { %550 = dma.vmem_to_hbm [thread:$0]  %s545_s23, 1280, %s902_s5, [#allocation5], %s695_s7, %s695_s7, %s696_s8  }
 0x152   :  { %685 = dma.done.wait [#allocation5], 1280  }
 0x153   :  { %686 = vsyncadd [#allocation5], 4294966016 }
 0x154   :  { %554 = vsyncpa [#allocation4], 1 }
 0x155   :  { %555 = vsyncpa [#allocation7], 1 }
 0x156   :  { %556 = vsyncpa [#allocation5], 1 }

</bundles_post_ra>
